<compile_context>
chip_gen: v7x
topology: tpu7x:2x2x1
jax: 0.10.0
libtpu: 0.0.40
codegen_flags: <defaults>
</compile_context>

<pallas_src>
import functools

import jax
import jax.numpy as jnp
from jax.experimental import pallas as pl
from jax.experimental.pallas import tpu as pltpu

EMB = 128          # embedding_size in the PyTorch module
NEG_SLOPE = 0.01   # F.leaky_relu negative_slope
BN_EPS = 1e-5      # torch.nn.BatchNorm1d default eps
FIN_PAD = 16       # node-feature dim (9) padded to 16
GP = 8             # padded graph dim for the pooled output (sublane multiple)

# Parameter-slab row layout (one (16, 128) f32 DMA):
#   rows 0..3  : biases b0..b3
#   rows 4..7  : folded-BN scales (bn1, bn2, bn3, identity)
#   rows 8..11 : folded-BN shifts (bn1, bn2, bn3, identity=0)
#   row  12    : output weight row (w_out[:, 0])
#   rows 13..15: unused (zeros)


# ----------------------------- fused Pallas kernel ---------------------------

def fused_gnn_kernel(a_ref, x_ref, w0_ref, w_ref, p_ref, pool_ref, o_ref):
    """Entire forward pass in one kernel invocation (no grid).

    Layer i:  h <- (LeakyReLU(A_hat @ (h @ W_i) + b_i)) * scale_i + shift_i
    (scale/shift are the folded inference-mode BatchNorm affine; identity for the last
    layer), then global mean pool (matmul with the per-graph mean matrix) and the output
    projection as a VPU multiply + lane reduce.  A_hat and h never leave VMEM.
    """
    a = a_ref[...]                                  # (16, 16)
    p = p_ref[...]                                  # (16, 128) parameter slab

    # Layer 0: K=16 contraction against the padded (16, 128) first-layer weight.
    xw = jnp.dot(x_ref[...], w0_ref[...], preferred_element_type=jnp.float32)
    z = jnp.dot(a, xw, preferred_element_type=jnp.float32) + p[0:1, :]
    z = jnp.maximum(z, NEG_SLOPE * z)               # LeakyReLU
    h = z * p[4:5, :] + p[8:9, :]                   # folded BN

    # Layers 1..3 (statically unrolled), weights stacked as (3, 128, 128).
    for i in range(3):
        xw = jnp.dot(h, w_ref[i], preferred_element_type=jnp.float32)
        z = jnp.dot(a, xw, preferred_element_type=jnp.float32) + p[i + 1:i + 2, :]
        z = jnp.maximum(z, NEG_SLOPE * z)
        h = z * p[i + 5:i + 6, :] + p[i + 9:i + 10, :]

    pooled = jnp.dot(pool_ref[...], h, preferred_element_type=jnp.float32)   # (8, 128)
    # Output Linear(128, 1) without a zero-padded 128x128 matmul: VPU mul + lane reduce.
    res = jnp.sum(pooled * p[12:13, :], axis=-1, keepdims=True)              # (8, 1)
    o_ref[...] = jnp.broadcast_to(res, o_ref.shape)                          # lane-dense


# ------------------------------ wrapper ---------------------------------------

@functools.partial(jax.jit, static_argnames=("num_graphs",))
def molecular_gnn_forward(x, edge_index, batch_index, num_graphs, params):
    """Full forward pass.  Adjacency / pool-matrix build, padding and BN folding are
    plain JAX (matmul/one-hot based, no scatters) fused under the same jit; all layer
    matmuls, activations and normalization run inside a single fused Pallas kernel."""
    n, fin = x.shape
    np_ = ((n + 7) // 8) * 8            # pad node dim to a multiple of 8 (sublanes)

    # --- GCNConv normalized adjacency (PyG semantics, self-loops, edge_weight=1) ------
    # One-hot matmul instead of XLA scatter (scatter serializes and gates kernel start).
    src, dst = edge_index[0], edge_index[1]
    node_ids = jnp.arange(n)
    oh_src = (src[:, None] == node_ids[None, :]).astype(jnp.float32)    # (E, N)
    oh_dst = (dst[:, None] == node_ids[None, :]).astype(jnp.float32)    # (E, N)
    adj = oh_dst.T @ oh_src                                             # duplicate edges sum
    adj = adj + jnp.eye(n, dtype=jnp.float32)                           # self-loops
    deg = adj.sum(axis=1)
    dinv = jnp.where(deg > 0, jax.lax.rsqrt(deg), 0.0)
    a_hat = dinv[:, None] * adj * dinv[None, :]
    a_hat_p = jnp.zeros((np_, np_), jnp.float32).at[:n, :n].set(a_hat)

    # --- global_mean_pool as a [G, N] matrix of 1/|graph| entries ----------------------
    graph_ids = jnp.arange(num_graphs)
    onehot_g = (batch_index[None, :] == graph_ids[:, None]).astype(jnp.float32)  # (G, N)
    counts = onehot_g.sum(axis=1)
    pool = onehot_g / jnp.maximum(counts, 1.0)[:, None]
    pool_p = jnp.zeros((GP, np_), jnp.float32).at[:num_graphs, :n].set(pool)

    # --- node features / first-layer weight padded only to K=16 ------------------------
    x_p = jnp.zeros((np_, FIN_PAD), jnp.float32).at[:n, :fin].set(x)
    w0_p = jnp.zeros((FIN_PAD, EMB), jnp.float32).at[:fin, :].set(params["w0"])
    w_stack = jnp.stack([params["w1"], params["w2"], params["w3"]])      # (3, 128, 128)

    # --- fold inference-mode BatchNorm into per-channel scale/shift --------------------
    def bn_fold(p):
        scale = p["gamma"] * jax.lax.rsqrt(p["var"] + BN_EPS)
        return scale, p["beta"] - p["mean"] * scale

    s1, t1 = bn_fold(params["bn1"])
    s2, t2 = bn_fold(params["bn2"])
    s3, t3 = bn_fold(params["bn3"])
    ones = jnp.ones((EMB,), jnp.float32)
    zeros = jnp.zeros((EMB,), jnp.float32)

    # --- pack every small per-layer parameter into one lane-dense (16, 128) slab -------
    p_slab = jnp.stack([
        params["b0"], params["b1"], params["b2"], params["b3"],   # biases
        s1, s2, s3, ones,                                         # BN scales (+identity)
        t1, t2, t3, zeros,                                        # BN shifts (+identity)
        params["w_out"][:, 0],                                    # output weight row
        zeros, zeros, zeros,                                      # padding
    ]).astype(jnp.float32)                                        # (16, 128)

    vmem = pl.BlockSpec(memory_space=pltpu.MemorySpace.VMEM)
    out_p = pl.pallas_call(
        fused_gnn_kernel,
        in_specs=[vmem] * 6,
        out_specs=vmem,
        out_shape=jax.ShapeDtypeStruct((GP, EMB), jnp.float32),
    )(a_hat_p, x_p, w0_p, w_stack, p_slab, pool_p)

    # Output bias added on the host (kept out of the kernel on purpose).
    return out_p[:num_graphs, :1] + params["b_out"]       # [num_graphs, 1]

    # TODO(synk): training-mode Dropout(0.2) and BatchNorm batch-statistics are not
    # implemented (inference semantics only).


# --------------------------- reference (pure JAX) ----------------------------

def reference_forward(x, edge_index, batch_index, num_graphs, params):
    n = x.shape[0]
    src, dst = edge_index[0], edge_index[1]
    adj = jnp.zeros((n, n), jnp.float32).at[dst, src].add(1.0) + jnp.eye(n)
    deg = adj.sum(axis=1)
    dinv = jnp.where(deg > 0, jax.lax.rsqrt(deg), 0.0)
    a_hat = dinv[:, None] * adj * dinv[None, :]

    counts = jnp.zeros((num_graphs,), jnp.float32).at[batch_index].add(1.0)
    onehot = (batch_index[None, :] == jnp.arange(num_graphs)[:, None]).astype(jnp.float32)
    pool = onehot / counts[:, None]

    leaky = lambda h: jnp.where(h > 0, h, NEG_SLOPE * h)
    bn = lambda h, p: (h - p["mean"]) * jax.lax.rsqrt(p["var"] + BN_EPS) * p["gamma"] + p["beta"]

    h = bn(leaky(a_hat @ (x @ params["w0"]) + params["b0"]), params["bn1"])
    h = bn(leaky(a_hat @ (h @ params["w1"]) + params["b1"]), params["bn2"])
    h = bn(leaky(a_hat @ (h @ params["w2"]) + params["b2"]), params["bn3"])
    h = leaky(a_hat @ (h @ params["w3"]) + params["b3"])
    return (pool @ h) @ params["w_out"] + params["b_out"]


# ---------------------------------- main -------------------------------------

def init_params(key):
    ks = jax.random.split(key, 20)

    def glorot(k, shape):
        lim = (6.0 / (shape[0] + shape[1])) ** 0.5
        return jax.random.uniform(k, shape, jnp.float32, -lim, lim)

    def bn_params(k):
        k1, k2, k3, k4 = jax.random.split(k, 4)
        return {
            "gamma": 1.0 + 0.1 * jax.random.normal(k1, (EMB,), jnp.float32),
            "beta": 0.1 * jax.random.normal(k2, (EMB,), jnp.float32),
            "mean": 0.05 * jax.random.normal(k3, (EMB,), jnp.float32),
            "var": jax.random.uniform(k4, (EMB,), jnp.float32, 0.5, 1.5),
        }

    return {
        "w0": glorot(ks[0], (9, EMB)),   "b0": 0.01 * jax.random.normal(ks[1], (EMB,)),
        "w1": glorot(ks[2], (EMB, EMB)), "b1": 0.01 * jax.random.normal(ks[3], (EMB,)),
        "w2": glorot(ks[4], (EMB, EMB)), "b2": 0.01 * jax.random.normal(ks[5], (EMB,)),
        "w3": glorot(ks[6], (EMB, EMB)), "b3": 0.01 * jax.random.normal(ks[7], (EMB,)),
        "w_out": glorot(ks[8], (EMB, 1)), "b_out": 0.01 * jax.random.normal(ks[9], (1,)),
        "bn1": bn_params(ks[10]), "bn2": bn_params(ks[11]), "bn3": bn_params(ks[12]),
    }


if __name__ == "__main__":
    key = jax.random.PRNGKey(0)
    k_param, k_x = jax.random.split(key)
    params = init_params(k_param)

    # Two small molecule-like graphs: graph 0 = nodes 0..6, graph 1 = nodes 7..11.
    N, NUM_GRAPHS = 12, 2
    und_edges = [(0, 1), (1, 2), (2, 3), (3, 4), (4, 5), (5, 6), (6, 0), (2, 5),
                 (7, 8), (8, 9), (9, 10), (10, 11), (11, 7)]
    src = [a for a, b in und_edges] + [b for a, b in und_edges]
    dst = [b for a, b in und_edges] + [a for a, b in und_edges]
    edge_index = jnp.array([src, dst], dtype=jnp.int32)            # [2, 26]
    batch_index = jnp.array([0] * 7 + [1] * 5, dtype=jnp.int32)    # [12]
    x = jax.random.normal(k_x, (N, 9), jnp.float32)                # [12, 9] node features

    out = molecular_gnn_forward(x, edge_index, batch_index, NUM_GRAPHS, params)
    out = jax.block_until_ready(out)

    ref = reference_forward(x, edge_index, batch_index, NUM_GRAPHS, params)
    assert out.shape == (NUM_GRAPHS, 1), out.shape
    assert jnp.allclose(out, ref, rtol=1e-4, atol=1e-4), (out, ref)

    print("KERNEL_OK")
</pallas_src>

<mosaic_0001>
module attributes {stable_mosaic.version = 11 : i64} {
  func.func @fused_gnn_kernel(%arg0: memref<16x16xf32, #tpu.memory_space<vmem>>, %arg1: memref<16x16xf32, #tpu.memory_space<vmem>>, %arg2: memref<16x128xf32, #tpu.memory_space<vmem>>, %arg3: memref<3x128x128xf32, #tpu.memory_space<vmem>>, %arg4: memref<16x128xf32, #tpu.memory_space<vmem>>, %arg5: memref<8x16xf32, #tpu.memory_space<vmem>>, %arg6: memref<8x128xf32, #tpu.memory_space<vmem>>) attributes {dimension_semantics = [], scalar_prefetch = 0 : i64, scratch_operands = 0 : i64, tpu.core_type = #tpu.core_type<tc>} {
    %c0 = arith.constant 0 : index
    %c0_0 = arith.constant 0 : index
    %0 = vector.load %arg0[%c0, %c0_0] : memref<16x16xf32, #tpu.memory_space<vmem>>, vector<16x16xf32>
    %c0_1 = arith.constant 0 : index
    %c0_2 = arith.constant 0 : index
    %1 = vector.load %arg4[%c0_1, %c0_2] : memref<16x128xf32, #tpu.memory_space<vmem>>, vector<16x128xf32>
    %c0_3 = arith.constant 0 : index
    %c0_4 = arith.constant 0 : index
    %2 = vector.load %arg1[%c0_3, %c0_4] : memref<16x16xf32, #tpu.memory_space<vmem>>, vector<16x16xf32>
    %c0_5 = arith.constant 0 : index
    %c0_6 = arith.constant 0 : index
    %3 = vector.load %arg2[%c0_5, %c0_6] : memref<16x128xf32, #tpu.memory_space<vmem>>, vector<16x128xf32>
    %cst = arith.constant dense<0.000000e+00> : vector<16x128xf32>
    %4 = tpu.matmul %2, %3, %cst {dimension_numbers = #tpu.dot_dimension_numbers<[1], [0], [0], [1], [0, 0, 1, 1], [], []>} : vector<16x16xf32>, vector<16x128xf32>, vector<16x128xf32> -> vector<16x128xf32>
    %cst_7 = arith.constant dense<0.000000e+00> : vector<16x128xf32>
    %5 = tpu.matmul %0, %4, %cst_7 {dimension_numbers = #tpu.dot_dimension_numbers<[1], [0], [0], [1], [0, 0, 1, 1], [], []>} : vector<16x16xf32>, vector<16x128xf32>, vector<16x128xf32> -> vector<16x128xf32>
    %6 = vector.extract_strided_slice %1 {offsets = [0, 0], sizes = [1, 128], strides = [1, 1]} : vector<16x128xf32> to vector<1x128xf32>
    %7 = vector.broadcast %6 : vector<1x128xf32> to vector<16x128xf32>
    %8 = arith.addf %5, %7 : vector<16x128xf32>
    %cst_8 = arith.constant 0.00999999977 : f32
    %9 = vector.broadcast %cst_8 : f32 to vector<16x128xf32>
    %10 = arith.mulf %9, %8 : vector<16x128xf32>
    %11 = arith.maximumf %8, %10 : vector<16x128xf32>
    %12 = vector.extract_strided_slice %1 {offsets = [4, 0], sizes = [1, 128], strides = [1, 1]} : vector<16x128xf32> to vector<1x128xf32>
    %13 = vector.broadcast %12 : vector<1x128xf32> to vector<16x128xf32>
    %14 = arith.mulf %11, %13 : vector<16x128xf32>
    %15 = vector.extract_strided_slice %1 {offsets = [8, 0], sizes = [1, 128], strides = [1, 1]} : vector<16x128xf32> to vector<1x128xf32>
    %16 = vector.broadcast %15 : vector<1x128xf32> to vector<16x128xf32>
    %17 = arith.addf %14, %16 : vector<16x128xf32>
    %c0_9 = arith.constant 0 : index
    %c0_10 = arith.constant 0 : index
    %c0_11 = arith.constant 0 : index
    %18 = vector.load %arg3[%c0_9, %c0_10, %c0_11] : memref<3x128x128xf32, #tpu.memory_space<vmem>>, vector<1x128x128xf32>
    %19 = vector.shape_cast %18 : vector<1x128x128xf32> to vector<128x128xf32>
    %cst_12 = arith.constant dense<0.000000e+00> : vector<16x128xf32>
    %20 = tpu.matmul %17, %19, %cst_12 {dimension_numbers = #tpu.dot_dimension_numbers<[1], [0], [0], [1], [0, 0, 1, 1], [], []>} : vector<16x128xf32>, vector<128x128xf32>, vector<16x128xf32> -> vector<16x128xf32>
    %cst_13 = arith.constant dense<0.000000e+00> : vector<16x128xf32>
    %21 = tpu.matmul %0, %20, %cst_13 {dimension_numbers = #tpu.dot_dimension_numbers<[1], [0], [0], [1], [0, 0, 1, 1], [], []>} : vector<16x16xf32>, vector<16x128xf32>, vector<16x128xf32> -> vector<16x128xf32>
    %22 = vector.extract_strided_slice %1 {offsets = [1, 0], sizes = [1, 128], strides = [1, 1]} : vector<16x128xf32> to vector<1x128xf32>
    %23 = vector.broadcast %22 : vector<1x128xf32> to vector<16x128xf32>
    %24 = arith.addf %21, %23 : vector<16x128xf32>
    %cst_14 = arith.constant 0.00999999977 : f32
    %25 = vector.broadcast %cst_14 : f32 to vector<16x128xf32>
    %26 = arith.mulf %25, %24 : vector<16x128xf32>
    %27 = arith.maximumf %24, %26 : vector<16x128xf32>
    %28 = vector.extract_strided_slice %1 {offsets = [5, 0], sizes = [1, 128], strides = [1, 1]} : vector<16x128xf32> to vector<1x128xf32>
    %29 = vector.broadcast %28 : vector<1x128xf32> to vector<16x128xf32>
    %30 = arith.mulf %27, %29 : vector<16x128xf32>
    %31 = vector.extract_strided_slice %1 {offsets = [9, 0], sizes = [1, 128], strides = [1, 1]} : vector<16x128xf32> to vector<1x128xf32>
    %32 = vector.broadcast %31 : vector<1x128xf32> to vector<16x128xf32>
    %33 = arith.addf %30, %32 : vector<16x128xf32>
    %c1 = arith.constant 1 : index
    %c0_15 = arith.constant 0 : index
    %c0_16 = arith.constant 0 : index
    %34 = vector.load %arg3[%c1, %c0_15, %c0_16] : memref<3x128x128xf32, #tpu.memory_space<vmem>>, vector<1x128x128xf32>
    %35 = vector.shape_cast %34 : vector<1x128x128xf32> to vector<128x128xf32>
    %cst_17 = arith.constant dense<0.000000e+00> : vector<16x128xf32>
    %36 = tpu.matmul %33, %35, %cst_17 {dimension_numbers = #tpu.dot_dimension_numbers<[1], [0], [0], [1], [0, 0, 1, 1], [], []>} : vector<16x128xf32>, vector<128x128xf32>, vector<16x128xf32> -> vector<16x128xf32>
    %cst_18 = arith.constant dense<0.000000e+00> : vector<16x128xf32>
    %37 = tpu.matmul %0, %36, %cst_18 {dimension_numbers = #tpu.dot_dimension_numbers<[1], [0], [0], [1], [0, 0, 1, 1], [], []>} : vector<16x16xf32>, vector<16x128xf32>, vector<16x128xf32> -> vector<16x128xf32>
    %38 = vector.extract_strided_slice %1 {offsets = [2, 0], sizes = [1, 128], strides = [1, 1]} : vector<16x128xf32> to vector<1x128xf32>
    %39 = vector.broadcast %38 : vector<1x128xf32> to vector<16x128xf32>
    %40 = arith.addf %37, %39 : vector<16x128xf32>
    %cst_19 = arith.constant 0.00999999977 : f32
    %41 = vector.broadcast %cst_19 : f32 to vector<16x128xf32>
    %42 = arith.mulf %41, %40 : vector<16x128xf32>
    %43 = arith.maximumf %40, %42 : vector<16x128xf32>
    %44 = vector.extract_strided_slice %1 {offsets = [6, 0], sizes = [1, 128], strides = [1, 1]} : vector<16x128xf32> to vector<1x128xf32>
    %45 = vector.broadcast %44 : vector<1x128xf32> to vector<16x128xf32>
    %46 = arith.mulf %43, %45 : vector<16x128xf32>
    %47 = vector.extract_strided_slice %1 {offsets = [10, 0], sizes = [1, 128], strides = [1, 1]} : vector<16x128xf32> to vector<1x128xf32>
    %48 = vector.broadcast %47 : vector<1x128xf32> to vector<16x128xf32>
    %49 = arith.addf %46, %48 : vector<16x128xf32>
    %c2 = arith.constant 2 : index
    %c0_20 = arith.constant 0 : index
    %c0_21 = arith.constant 0 : index
    %50 = vector.load %arg3[%c2, %c0_20, %c0_21] : memref<3x128x128xf32, #tpu.memory_space<vmem>>, vector<1x128x128xf32>
    %51 = vector.shape_cast %50 : vector<1x128x128xf32> to vector<128x128xf32>
    %cst_22 = arith.constant dense<0.000000e+00> : vector<16x128xf32>
    %52 = tpu.matmul %49, %51, %cst_22 {dimension_numbers = #tpu.dot_dimension_numbers<[1], [0], [0], [1], [0, 0, 1, 1], [], []>} : vector<16x128xf32>, vector<128x128xf32>, vector<16x128xf32> -> vector<16x128xf32>
    %cst_23 = arith.constant dense<0.000000e+00> : vector<16x128xf32>
    %53 = tpu.matmul %0, %52, %cst_23 {dimension_numbers = #tpu.dot_dimension_numbers<[1], [0], [0], [1], [0, 0, 1, 1], [], []>} : vector<16x16xf32>, vector<16x128xf32>, vector<16x128xf32> -> vector<16x128xf32>
    %54 = vector.extract_strided_slice %1 {offsets = [3, 0], sizes = [1, 128], strides = [1, 1]} : vector<16x128xf32> to vector<1x128xf32>
    %55 = vector.broadcast %54 : vector<1x128xf32> to vector<16x128xf32>
    %56 = arith.addf %53, %55 : vector<16x128xf32>
    %cst_24 = arith.constant 0.00999999977 : f32
    %57 = vector.broadcast %cst_24 : f32 to vector<16x128xf32>
    %58 = arith.mulf %57, %56 : vector<16x128xf32>
    %59 = arith.maximumf %56, %58 : vector<16x128xf32>
    %60 = vector.extract_strided_slice %1 {offsets = [7, 0], sizes = [1, 128], strides = [1, 1]} : vector<16x128xf32> to vector<1x128xf32>
    %61 = vector.broadcast %60 : vector<1x128xf32> to vector<16x128xf32>
    %62 = arith.mulf %59, %61 : vector<16x128xf32>
    %63 = vector.extract_strided_slice %1 {offsets = [11, 0], sizes = [1, 128], strides = [1, 1]} : vector<16x128xf32> to vector<1x128xf32>
    %64 = vector.broadcast %63 : vector<1x128xf32> to vector<16x128xf32>
    %65 = arith.addf %62, %64 : vector<16x128xf32>
    %c0_25 = arith.constant 0 : index
    %c0_26 = arith.constant 0 : index
    %66 = vector.load %arg5[%c0_25, %c0_26] : memref<8x16xf32, #tpu.memory_space<vmem>>, vector<8x16xf32>
    %cst_27 = arith.constant dense<0.000000e+00> : vector<8x128xf32>
    %67 = tpu.matmul %66, %65, %cst_27 {dimension_numbers = #tpu.dot_dimension_numbers<[1], [0], [0], [1], [0, 0, 1, 1], [], []>} : vector<8x16xf32>, vector<16x128xf32>, vector<8x128xf32> -> vector<8x128xf32>
    %68 = vector.extract_strided_slice %1 {offsets = [12, 0], sizes = [1, 128], strides = [1, 1]} : vector<16x128xf32> to vector<1x128xf32>
    %69 = vector.broadcast %68 : vector<1x128xf32> to vector<8x128xf32>
    %70 = arith.mulf %67, %69 : vector<8x128xf32>
    %cst_28 = arith.constant dense<0.000000e+00> : vector<8xf32>
    %71 = vector.multi_reduction <add>, %70, %cst_28 [1] : vector<8x128xf32> to vector<8xf32>
    %72 = vector.shape_cast %71 : vector<8xf32> to vector<8x1xf32>
    %73 = vector.shape_cast %72 : vector<8x1xf32> to vector<8x1xf32>
    %74 = vector.broadcast %73 : vector<8x1xf32> to vector<8x128xf32>
    %c0_29 = arith.constant 0 : index
    %c0_30 = arith.constant 0 : index
    %75 = vector.load %arg6[%c0_29, %c0_30] : memref<8x128xf32, #tpu.memory_space<vmem>>, vector<8x128xf32>
    tpu.vector_store %arg6[%c0_29, %c0_30], %74 {strides = array<i32>} : memref<8x128xf32, #tpu.memory_space<vmem>>, vector<8x128xf32>,
    return
  }
}

</mosaic_0001>

<bundles_post_ra>
// kernel: molecular_gnn_forward.1
= control target key start
LH: loop header
LB: loop body
LE: loop exit
PB: predicated region body
PF: predicated region fallthrough
CT: control target
= control target key end

     0   :  { %vm31_vm0 = vcmask 130048   ;;  %v113_v34 = vlaneseq  ;;  %vm1250_vm1 = vmmov 0   ;;  %s1515_s2 = inlined_call_operand.vmem [shape: f32[16,128], index: 2, kind: input, shape index: {}]   ;;  %s1516_s1 = inlined_call_operand.vmem [shape: f32[16,16], index: 1, kind: input, shape index: {}]   ;;  %s1517_s0 = inlined_call_operand.vmem [shape: f32[16,16], index: 0, kind: input, shape index: {}]   ;;  %s1518_s3 = inlined_call_operand.vmem [shape: f32[3,128,128], index: 3, kind: input, shape index: {}]   ;;  %s1519_s4 = inlined_call_operand.vmem [shape: f32[16,128], index: 4, kind: input, shape index: {}]   ;;  %s1520_s5 = inlined_call_operand.vmem [shape: f32[8,16], index: 5, kind: input, shape index: {}]   ;;  %s1521_s6 = inlined_call_operand.vmem [shape: f32[8,128], index: 6, kind: output, shape index: {}]  }
   0x1   :  { %v29_v0 = vld [vmem:[%s1515_s2] sm:$0xff]  ;;  %v30_v1 = vld [vmem:[%s1515_s2 + $0x8] sm:$0xff]  ;;  %v216_v8 = vld [vmem:[%s1518_s3 + $0x10] sm:$0xff] }
   0x2   :  { %v27_v2 = vld [vmem:[%s1516_s1] sm:$0xff]  ;;  %v1127_v3 = vpack.c.bf16 %v30_v1, %v29_v0  ;;  %v28_v4 = vld [vmem:[%s1516_s1 + $0x8] sm:$0xff]  ;;  %v217_v10 = vld [vmem:[%s1518_s3 + $0x18] sm:$0xff]  ;;  %v1365_v35 = vshrl.u32 %v113_v34, 7 }
   0x3   :  { %984 = vmatprep.mubr.msk.f32.mxu1 %vm31_vm0, %v27_v2  ;;  %v1304_v5 = vld [vmem:[%s1517_s0] sm:$0xff]  ;;  %v215_v7 = vld [vmem:[%s1518_s3 + $0x8] sm:$0xff]  ;;  %v1139_v11 = vpack.c.bf16 %v217_v10, %v216_v8  ;;  %v220_v15 = vld [vmem:[%s1518_s3 + $0x30] sm:$0xff] }
   0x4   :  { %1128 = vmatprep.subr.bf16.mxu1 %v1127_v3  ;;  %v214_v6 = vld [vmem:[%s1518_s3] sm:$0xff]  ;;  %v219_v13 = vld [vmem:[%s1518_s3 + $0x28] sm:$0xff]  ;;  %v221_v16 = vld [vmem:[%s1518_s3 + $0x38] sm:$0xff]  ;;  %v115_v36 = vsub.s32 0, %v1365_v35  ;;  %v204_v39 = vsub.s32 4, %v1365_v35 }
   0x5   :  { %1130 = vmatpush3.bf16.msra.mxu1 %v1127_v3  ;;  %v1135_v9 = vpack.c.bf16 %v215_v7, %v214_v6  ;;  %v218_v12 = vld [vmem:[%s1518_s3 + $0x20] sm:$0xff]  ;;  %v1147_v17 = vpack.c.bf16 %v221_v16, %v220_v15  ;;  %v223_v19 = vld [vmem:[%s1518_s3 + $0x48] sm:$0xff]  ;;  %v224_v25 = vld [vmem:[%s1518_s3 + $0x50] sm:$0xff] }
   0x6   :  { %v1143_v14 = vpack.c.bf16 %v219_v13, %v218_v12  ;;  %v222_v18 = vld [vmem:[%s1518_s3 + $0x40] sm:$0xff]  ;;  %v1341_v24 = vld [vmem:[%s1517_s0 + $0x8] sm:$0xff]  ;;  %v225_v26 = vld [vmem:[%s1518_s3 + $0x58] sm:$0xff] }
   0x7   :  { %1136 = vmatprep.subr.bf16.mxu0 %v1135_v9  ;;  %v1151_v20 = vpack.c.bf16 %v223_v19, %v222_v18  ;;  %v1155_v27 = vpack.c.bf16 %v225_v26, %v224_v25  ;;  %v226_v28 = vld [vmem:[%s1518_s3 + $0x60] sm:$0xff]  ;;  %v227_v29 = vld [vmem:[%s1518_s3 + $0x68] sm:$0xff]  ;;  %v228_v31 = vld [vmem:[%s1518_s3 + $0x70] sm:$0xff]  ;;  %v307_v19 = vsub.s32 1, %v1365_v35 }
   0x8   :  { %985 = vmatmul.mubr.msk.f32.vlgmr.msra.gmra.mrb[0].mxu1 %vm31_vm0, %v28_v4  ;;  %1138 = vmatpush3.bf16.msra.mxu0 %v1135_v9  ;;  %v1159_v30 = vpack.c.bf16 %v227_v29, %v226_v28  ;;  %v229_v32 = vld [vmem:[%s1518_s3 + $0x78] sm:$0xff]  ;;  %v1371_v37 = vld [vmem:[%s1519_s4] sm:$0xff]  ;;  %v1378_v45 = vld [vmem:[%s1519_s4 + $0x8] sm:$0xff] }
   0x9   :  { %991 = vmatprep.mubr.msk.f32.mxu1 %vm31_vm0, %v1304_v5  ;;  %1140 = vmatprep.subr.bf16.mxu0 %v1139_v11  ;;  %v1163_v33 = vpack.c.bf16 %v229_v32, %v228_v31  ;;  %v116_v38 = vrot.slane %v1371_v37, %v115_v36  ;;  %v205_v46 = vrot.slane %v1371_v37, %v204_v39  ;;  %v866_v55 = vld [vmem:[%s1518_s3 + $0x80] sm:$0xff]  ;;  %v867_v56 = vld [vmem:[%s1518_s3 + $0x88] sm:$0xff]  ;;  %v868_v61 = vld [vmem:[%s1518_s3 + $0x90] sm:$0xff] }
   0xa   :  { %v211_v50 = vrot.slane %v1378_v45, %v115_v36  ;;  %v1171_v60 = vpack.c.bf16 %v867_v56, %v866_v55  ;;  %v869_v62 = vld [vmem:[%s1518_s3 + $0x98] sm:$0xff]  ;;  %v870_v0 = vld [vmem:[%s1518_s3 + $0xa0] sm:$0xff]  ;;  %v871_v1 = vld [vmem:[%s1518_s3 + $0xa8] sm:$0xff]  ;;  %v397_v32 = vrot.slane %v1378_v45, %v307_v19 }
   0xb   :  { %v1175_v63 = vpack.c.bf16 %v869_v62, %v868_v61  ;;  %v1179_v2 = vpack.c.bf16 %v871_v1, %v870_v0  ;;  %v872_v3 = vld [vmem:[%s1518_s3 + $0xb0] sm:$0xff]  ;;  %v873_v4 = vld [vmem:[%s1518_s3 + $0xb8] sm:$0xff]  ;;  %v874_v7 = vld [vmem:[%s1518_s3 + $0xc0] sm:$0xff] }
   0xc   :  { %1142 = vmatpush3.bf16.msra.mxu0 %v1139_v11  ;;  %v1183_v6 = vpack.c.bf16 %v873_v4, %v872_v3  ;;  %v875_v8 = vld [vmem:[%s1518_s3 + $0xc8] sm:$0xff]  ;;  %v876_v10 = vld [vmem:[%s1518_s3 + $0xd0] sm:$0xff]  ;;  %v877_v11 = vld [vmem:[%s1518_s3 + $0xd8] sm:$0xff]  ;;  %v494_v3 = vsub.s32 2, %v1365_v35 }
   0xd   :  { %1144 = vmatprep.subr.bf16.mxu0 %v1143_v14  ;;  %v1187_v9 = vpack.c.bf16 %v875_v8, %v874_v7  ;;  %v1191_v12 = vpack.c.bf16 %v877_v11, %v876_v10  ;;  %v878_v13 = vld [vmem:[%s1518_s3 + $0xe0] sm:$0xff]  ;;  %v880_v16 = vld [vmem:[%s1518_s3 + $0xf0] sm:$0xff]  ;;  %v899_v1 = vld [vmem:[%s1518_s3 + $0x178] sm:$0xff] }
   0xe   :  { %v896_v62 = vld [vmem:[%s1518_s3 + $0x160] sm:$0xff]  ;;  %v898_v0 = vld [vmem:[%s1518_s3 + $0x170] sm:$0xff]  ;;  %v495_v4 = vrot.slane %v1371_v37, %v494_v3 }
  0x10   :  { %1146 = vmatpush3.bf16.msra.mxu0 %v1143_v14  ;;  %v879_v14 = vld [vmem:[%s1518_s3 + $0xe8] sm:$0xff] }
  0x11   :  { %1148 = vmatprep.subr.bf16.mxu0 %v1147_v17  ;;  %v1195_v15 = vpack.c.bf16 %v879_v14, %v878_v13 }
  0x14   :  { %1150 = vmatpush3.bf16.msra.mxu0 %v1147_v17  ;;  %v881_v17 = vld [vmem:[%s1518_s3 + $0xf8] sm:$0xff] }
  0x15   :  { %1152 = vmatprep.subr.bf16.mxu0 %v1151_v20  ;;  %v1199_v18 = vpack.c.bf16 %v881_v17, %v880_v16  ;;  %v584_v16 = vrot.slane %v1378_v45, %v494_v3 }
  0x18   :  { %1154 = vmatpush3.bf16.msra.mxu0 %v1151_v20  ;;  %v308_v20 = vrot.slane %v1371_v37, %v307_v19 }
  0x19   :  { %1156 = vmatprep.subr.bf16.mxu0 %v1155_v27 }
  0x1c   :  { %1158 = vmatpush3.bf16.msra.mxu0 %v1155_v27 }
  0x1d   :  { %1160 = vmatprep.subr.bf16.mxu0 %v1159_v30 }
  0x20   :  { %1162 = vmatpush3.bf16.msra.mxu0 %v1159_v30 }
  0x21   :  { %1164 = vmatprep.subr.bf16.mxu0 %v1163_v33 }
  0x24   :  { %1166 = vmatpush3.bf16.msra.mxu0 %v1163_v33 }
  0xdb   :  { %v986_v21 = vpop.f32.mrb[0].mxu1 }
  0xdc   :  { %v104_v22 = vpop.f32.mrb[1].mxu1 }
  0xdd   :  { %v1131_v23 = vpack.c.bf16 %v986_v21, %v104_v22  ;;  %v390_v21 = vsub.s32 5, %v1365_v35 }
  0xdf   :  { %1132 = vmatprep.subr.bf16.mxu1 %v1131_v23  ;;  %v391_v28 = vrot.slane %v1371_v37, %v390_v21 }
  0xe0   :  { %1134 = vmatpush3.bf16.msra.mxu1 %v1131_v23 }
  0xe3   :  { %992 = vmatmul.mubr.msk.f32.vlgmr.msra.gmra.mrb[2].mxu1 %vm31_vm0, %v1341_v24 }
  0xe4   :  { %1033 = vmatprep.mubr.msk.f32.mxu1 %vm31_vm0, %v1304_v5 }
 0x1b6   :  { %v993_v40 = vpop.f32.mrb[2].mxu1 }
 0x1b7   :  { %v195_v41 = vadd.f32 %v993_v40, %v116_v38  ;;  %v189_v42 = vpop.f32.mrb[3].mxu1  ;;  %v884_v40 = vld [vmem:[%s1518_s3 + $0x100] sm:$0xff] }
 0x1b8   :  { %v190_v43 = vadd.f32 %v189_v42, %v116_v38  ;;  %v886_v42 = vld [vmem:[%s1518_s3 + $0x110] sm:$0xff] }
 0x1b9   :  { %v199_v44 = vmul.f32 0.01, %v195_v41 }
 0x1ba   :  { %v198_v47 = vmul.f32 0.01, %v190_v43 }
 0x1bb   :  { %v201_v48 = vmax.f32 %v195_v41, %v199_v44  ;;  %v885_v41 = vld [vmem:[%s1518_s3 + $0x108] sm:$0xff]  ;;  %v887_v44 = vld [vmem:[%s1518_s3 + $0x118] sm:$0xff] }
 0x1bc   :  { %v200_v49 = vmax.f32 %v190_v43, %v198_v47  ;;  %v1207_v43 = vpack.c.bf16 %v885_v41, %v884_v40  ;;  %v888_v47 = vld [vmem:[%s1518_s3 + $0x120] sm:$0xff] }
 0x1bd   :  { %v207_v51 = vmul.f32 %v205_v46, %v201_v48  ;;  %v889_v48 = vld [vmem:[%s1518_s3 + $0x128] sm:$0xff] }
 0x1be   :  { %v206_v52 = vmul.f32 %v205_v46, %v200_v49  ;;  %v1211_v46 = vpack.c.bf16 %v887_v44, %v886_v42  ;;  %1208 = vmatprep.subr.bf16.mxu0 %v1207_v43  ;;  %v1215_v49 = vpack.c.bf16 %v889_v48, %v888_v47  ;;  %v774_v48 = vld [vmem:[%s1520_s5] sm:$0xff] }
 0x1bf   :  { %v213_v54 = vadd.f32 %v211_v50, %v207_v51  ;;  %v891_v51 = vld [vmem:[%s1518_s3 + $0x138] sm:$0xff] }
 0x1c0   :  { %v212_v53 = vadd.f32 %v211_v50, %v206_v52  ;;  %v890_v50 = vld [vmem:[%s1518_s3 + $0x130] sm:$0xff] }
 0x1c1   :  { %v1219_v52 = vpack.c.bf16 %v891_v51, %v890_v50 }
 0x1c2   :  { %1026 = vmatprep.mubr.f32.mxu0 %v212_v53  ;;  %v892_v53 = vld [vmem:[%s1518_s3 + $0x140] sm:$0xff] }
 0x1c3   :  { %1027 = vmatmul.mubr.f32.vlgmr.msra.gmra.mrb[0].mxu0 %v213_v54  ;;  %v893_v54 = vld [vmem:[%s1518_s3 + $0x148] sm:$0xff] }
 0x1c4   :  { %1210 = vmatpush3.bf16.msra.mxu0 %v1207_v43  ;;  %v1223_v55 = vpack.c.bf16 %v893_v54, %v892_v53 }
 0x1c5   :  { %1212 = vmatprep.subr.bf16.mxu0 %v1211_v46 }
 0x1c8   :  { %1214 = vmatpush3.bf16.msra.mxu0 %v1211_v46 }
 0x1c9   :  { %1216 = vmatprep.subr.bf16.mxu0 %v1215_v49 }
 0x1cc   :  { %1218 = vmatpush3.bf16.msra.mxu0 %v1215_v49 }
 0x1cd   :  { %1220 = vmatprep.subr.bf16.mxu0 %v1219_v52 }
 0x1d0   :  { %1222 = vmatpush3.bf16.msra.mxu0 %v1219_v52 }
 0x1d1   :  { %1224 = vmatprep.subr.bf16.mxu0 %v1223_v55 }
 0x1d4   :  { %1226 = vmatpush3.bf16.msra.mxu0 %v1223_v55 }
 0x296   :  { %v1028_v57 = vpop.f32.mrb[0].mxu0 }
 0x297   :  { %v296_v58 = vpop.f32.mrb[1].mxu0 }
 0x298   :  { %v1167_v59 = vpack.c.bf16 %v1028_v57, %v296_v58 }
 0x29a   :  { %1168 = vmatprep.subr.bf16.mxu1 %v1167_v59 }
 0x29b   :  { %1170 = vmatpush3.bf16.msra.mxu1 %v1167_v59  ;;  %v894_v59 = vld [vmem:[%s1518_s3 + $0x150] sm:$0xff] }
 0x29c   :  { %1172 = vmatprep.subr.bf16.mxu1 %v1171_v60 }
 0x29e   :  { %1034 = vmatmul.mubr.msk.f32.vlgmr.msra.gmra.mrb[4].mxu1 %vm31_vm0, %v1341_v24 }
 0x29f   :  { %1174 = vmatpush3.bf16.msra.mxu1 %v1171_v60  ;;  %v895_v60 = vld [vmem:[%s1518_s3 + $0x158] sm:$0xff] }
 0x2a0   :  { %1176 = vmatprep.subr.bf16.mxu1 %v1175_v63  ;;  %v1227_v61 = vpack.c.bf16 %v895_v60, %v894_v59 }
 0x2a2   :  { %1228 = vmatprep.subr.bf16.mxu0 %v1227_v61 }
 0x2a3   :  { %1178 = vmatpush3.bf16.msra.mxu1 %v1175_v63  ;;  %1230 = vmatpush3.bf16.msra.mxu0 %v1227_v61  ;;  %v897_v63 = vld [vmem:[%s1518_s3 + $0x168] sm:$0xff] }
 0x2a4   :  { %1180 = vmatprep.subr.bf16.mxu1 %v1179_v2 }
 0x2a7   :  { %1182 = vmatpush3.bf16.msra.mxu1 %v1179_v2  ;;  %v1235_v2 = vpack.c.bf16 %v899_v1, %v898_v0 }
 0x2a8   :  { %1184 = vmatprep.subr.bf16.mxu1 %v1183_v6 }
 0x2ab   :  { %1186 = vmatpush3.bf16.msra.mxu1 %v1183_v6  ;;  %v577_v6 = vsub.s32 6, %v1365_v35 }
 0x2ac   :  { %1188 = vmatprep.subr.bf16.mxu1 %v1187_v9 }
 0x2af   :  { %1190 = vmatpush3.bf16.msra.mxu1 %v1187_v9 }
 0x2b0   :  { %1192 = vmatprep.subr.bf16.mxu1 %v1191_v12 }
 0x2b3   :  { %1194 = vmatpush3.bf16.msra.mxu1 %v1191_v12  ;;  %v578_v12 = vrot.slane %v1371_v37, %v577_v6 }
 0x2b4   :  { %1196 = vmatprep.subr.bf16.mxu1 %v1195_v15 }
 0x2b7   :  { %1198 = vmatpush3.bf16.msra.mxu1 %v1195_v15 }
 0x2b8   :  { %1200 = vmatprep.subr.bf16.mxu1 %v1199_v18 }
 0x2bb   :  { %1202 = vmatpush3.bf16.msra.mxu1 %v1199_v18 }
 0x371   :  { %v1035_v22 = vpop.f32.mrb[4].mxu1 }
 0x372   :  { %v381_v23 = vadd.f32 %v1035_v22, %v308_v20  ;;  %v375_v25 = vpop.f32.mrb[5].mxu1 }
 0x373   :  { %v376_v26 = vadd.f32 %v375_v25, %v308_v20  ;;  %v1249_v25 = vmov 0.0|0.0  }
 0x374   :  { %v385_v27 = vmul.f32 0.01, %v381_v23 }
 0x375   :  { %v384_v29 = vmul.f32 0.01, %v376_v26 }
 0x376   :  { %v387_v30 = vmax.f32 %v381_v23, %v385_v27  ;;  %v681_v27 = vsub.s32 3, %v1365_v35 }
 0x377   :  { %v386_v31 = vmax.f32 %v376_v26, %v384_v29  ;;  %v1251_v26 = vmov 0.0   ;;  %v764_v29 = vsub.s32 7, %v1365_v35 }
 0x378   :  { %v393_v33 = vmul.f32 %v391_v28, %v387_v30  ;;  %v771_v40 = vrot.slane %v1378_v45, %v681_v27 }
 0x379   :  { %v392_v34 = vmul.f32 %v391_v28, %v386_v31  ;;  %v682_v28 = vrot.slane %v1371_v37, %v681_v27 }
 0x37a   :  { %v399_v38 = vadd.f32 %v397_v32, %v393_v33 }
 0x37b   :  { %v398_v36 = vadd.f32 %v397_v32, %v392_v34 }
 0x37d   :  { %1068 = vmatprep.mubr.f32.mxu1 %v398_v36  ;;  %v765_v36 = vrot.slane %v1371_v37, %v764_v29  ;;  %v851_v37 = vrot.slane %v1378_v45, %v204_v39 }
 0x37e   :  { %1069 = vmatmul.mubr.f32.vlgmr.msra.gmra.mrb[6].mxu1 %v399_v38 }
 0x37f   :  { %1075 = vmatprep.mubr.msk.f32.mxu1 %vm31_vm0, %v1304_v5 }
 0x451   :  { %v1070_v56 = vpop.f32.mrb[6].mxu1 }
 0x452   :  { %v483_v57 = vpop.f32.mrb[7].mxu1 }
 0x453   :  { %v1203_v58 = vpack.c.bf16 %v1070_v56, %v483_v57 }
 0x455   :  { %1204 = vmatprep.subr.bf16.mxu1 %v1203_v58 }
 0x456   :  { %1206 = vmatpush3.bf16.msra.mxu1 %v1203_v58 }
 0x459   :  { %1076 = vmatmul.mubr.msk.f32.vlgmr.msra.gmra.mrb[8].mxu1 %vm31_vm0, %v1341_v24 }
 0x45a   :  { %1117 = vmatprep.mubr.msk.f32.mxu1 %vm31_vm0, %v1304_v5  ;;  %v1231_v5 = vpack.c.bf16 %v897_v63, %v896_v62 }
 0x45c   :  { %1232 = vmatprep.subr.bf16.mxu0 %v1231_v5 }
 0x45d   :  { %1234 = vmatpush3.bf16.msra.mxu0 %v1231_v5 }
 0x45e   :  { %1236 = vmatprep.subr.bf16.mxu0 %v1235_v2 }
 0x461   :  { %1238 = vmatpush3.bf16.msra.mxu0 %v1235_v2 }
 0x52c   :  { %v1077_v7 = vpop.f32.mrb[8].mxu1 }
 0x52d   :  { %v568_v8 = vadd.f32 %v1077_v7, %v495_v4  ;;  %v562_v9 = vpop.f32.mrb[9].mxu1 }
 0x52e   :  { %v563_v10 = vadd.f32 %v562_v9, %v495_v4 }
 0x52f   :  { %v572_v11 = vmul.f32 0.01, %v568_v8 }
 0x530   :  { %v571_v13 = vmul.f32 0.01, %v563_v10 }
 0x531   :  { %v574_v14 = vmax.f32 %v568_v8, %v572_v11 }
 0x532   :  { %v573_v15 = vmax.f32 %v563_v10, %v571_v13 }
 0x533   :  { %v580_v17 = vmul.f32 %v578_v12, %v574_v14 }
 0x534   :  { %v579_v18 = vmul.f32 %v578_v12, %v573_v15 }
 0x535   :  { %v586_v20 = vadd.f32 %v584_v16, %v580_v17 }
 0x536   :  { %v585_v19 = vadd.f32 %v584_v16, %v579_v18 }
 0x538   :  { %1110 = vmatprep.mubr.f32.mxu0 %v585_v19 }
 0x539   :  { %1111 = vmatmul.mubr.f32.vlgmr.msra.gmra.mrb[2].mxu0 %v586_v20 }
 0x60c   :  { %v1112_v21 = vpop.f32.mrb[2].mxu0 }
 0x60d   :  { %v670_v22 = vpop.f32.mrb[3].mxu0 }
 0x60e   :  { %v1239_v23 = vpack.c.bf16 %v1112_v21, %v670_v22 }
 0x610   :  { %1240 = vmatprep.subr.bf16.mxu1 %v1239_v23 }
 0x611   :  { %1242 = vmatpush3.bf16.msra.mxu1 %v1239_v23 }
 0x612   :  { %1243 = vmatprep.subr.bf16.mxu1 %v1249_v25 }
 0x614   :  { %1118 = vmatmul.mubr.msk.f32.vlgmr.msra.gmra.mrb[10].mxu1 %vm31_vm0, %v1341_v24 }
 0x615   :  { %1124 = vmatprep.mubr.msk.f32.mxu1 %vm1250_vm1, %v1251_v26 }
 0x6e7   :  { %v1119_v30 = vpop.f32.mrb[10].mxu1 }
 0x6e8   :  { %v755_v31 = vadd.f32 %v1119_v30, %v682_v28  ;;  %v749_v32 = vpop.f32.mrb[11].mxu1 }
 0x6e9   :  { %v750_v33 = vadd.f32 %v749_v32, %v682_v28 }
 0x6ea   :  { %v759_v34 = vmul.f32 0.01, %v755_v31 }
 0x6eb   :  { %v758_v38 = vmul.f32 0.01, %v750_v33 }
 0x6ec   :  { %v761_v24 = vmax.f32 %v755_v31, %v759_v34 }
 0x6ed   :  { %v760_v41 = vmax.f32 %v750_v33, %v758_v38 }
 0x6ee   :  { %v767_v42 = vmul.f32 %v765_v36, %v761_v24 }
 0x6ef   :  { %v766_v43 = vmul.f32 %v765_v36, %v760_v41 }
 0x6f0   :  { %v773_v44 = vadd.f32 %v771_v40, %v767_v42 }
 0x6f1   :  { %v772_v46 = vadd.f32 %v771_v40, %v766_v43 }
 0x6f3   :  { %v1244_v47 = vpack.c.bf16 %v773_v44, %v772_v46 }
 0x6f5   :  { %1245 = vmatpush3.bf16.msra.mxu1 %v1244_v47 }
 0x6f8   :  { %1125 = vmatmul.mubr.msk.f32.vlgmr.msra.gmra.mrb[12].mxu1 %vm31_vm0, %v774_v48 }
 0x7cb   :  { %v844_v49 = vpop.f32.mrb[12].mxu1 }
 0x7cc   :  { %v1126_v50 = vpop.f32.mrb[13].mxu1  ;;  %v852_v51 = vmul.f32 %v851_v37, %v844_v49 }
 0x7ce   :  { %853 = vadd.xlane.f32.xlu0 %v852_v51 }
 0x85b   :  { %v854_v52 = vpop.xlane.xlu0 %853 }
 0x85c   :  { %855 = vst [vmem:[%s1521_s6] sm:$0xff] %v854_v52 }

</bundles_post_ra>
